<compile_context>
chip_gen: v6e
topology: v6e:2x2x1
jax: 0.10.0
libtpu: 0.0.40
codegen_flags: <defaults>
</compile_context>

<pallas_src>
import jax
import jax.numpy as jnp
from jax import lax
from jax.experimental import pallas as pl
from jax.experimental.pallas import tpu as pltpu


def _round_up(x: int, m: int) -> int:
    return ((x + m - 1) // m) * m


def _linear_kernel(x_ref, w_ref, b_ref, o_ref):
    # x_ref: (TILE_M, K_pad)   collapsed (B*T, H_in) tile
    # w_ref: (N_pad, K_pad)    PyTorch nn.Linear layout (H_out, H_in), resident
    # b_ref: (1, N_pad)        bias, resident
    # o_ref: (TILE_M, N_pad)
    acc = lax.dot_general(
        x_ref[...], w_ref[...],
        dimension_numbers=(((1,), (1,)), ((), ())),   # contract K with K (trans-B)
        preferred_element_type=jnp.float32)
    acc = acc + b_ref[...].astype(jnp.float32)
    o_ref[...] = acc.astype(o_ref.dtype)


def _choose_tile_m(M: int, K_pad: int, N_pad: int, itemsize: int) -> int:
    # Conservative VMEM budget: double-buffered x/out tiles + resident weight
    # must fit comfortably under v7x's 64 MiB per-TC VMEM (and scoped defaults).
    budget = 24 * 1024 * 1024
    w_bytes = K_pad * N_pad * itemsize
    avail = max(budget - w_bytes, 2 * 1024 * 1024)
    per_row = 2 * (K_pad + N_pad) * itemsize          # 2 buffers each for x and out
    tile = avail // per_row
    tile = min(int(tile), 1024)                        # safe cap across v5e/v6e/v7x
    tile = max(tile, 8)
    tile = (tile // 8) * 8
    tile = min(tile, _round_up(M, 8))                  # don't over-tile tiny inputs
    return int(tile)


def sequence_wise_linear(x, weight, bias, compute_dtype=None):
    """SequenceWise(nn.Linear) forward.

    x:      (B, T, H_in)
    weight: (H_out, H_in)   -- PyTorch nn.Linear layout (consumed directly)
    bias:   (H_out,)
    compute_dtype: optional (e.g. jnp.bfloat16) to cast matmul operands;
                   accumulation stays f32, output keeps x.dtype.
    returns (B, T, H_out)
    """
    B, T, H_in = x.shape
    H_out = weight.shape[0]
    M = B * T

    out_dtype = x.dtype
    if compute_dtype is not None:
        x = x.astype(compute_dtype)
        weight = weight.astype(compute_dtype)

    itemsize = jnp.dtype(x.dtype).itemsize

    # Lane-dense padding of the feature dims (multiple of 128).
    K_pad = _round_up(H_in, 128)
    N_pad = _round_up(H_out, 128)

    tile_m = _choose_tile_m(M, K_pad, N_pad, itemsize)
    M_pad = _round_up(M, tile_m)
    grid_m = M_pad // tile_m

    # Collapse (B, T, H) -> (B*T, H)   [glue, same as x.view(B*T, -1)], then pad.
    x2d = x.reshape(M, H_in)
    x2d = jnp.pad(x2d, ((0, M_pad - M), (0, K_pad - H_in)))
    w_p = jnp.pad(weight, ((0, N_pad - H_out), (0, K_pad - H_in)))
    b_p = jnp.pad(bias.astype(jnp.float32), (0, N_pad - H_out)).reshape(1, N_pad)

    # VMEM headroom for the chosen tiles (double-buffered x/out + resident w/b).
    vmem_need = (2 * tile_m * (K_pad + N_pad) + K_pad * N_pad) * itemsize \
        + 2 * N_pad * 4
    vmem_limit = min(max(int(vmem_need * 3 // 2) + (2 << 20), 16 << 20), 64 << 20)

    cost = pl.CostEstimate(
        flops=2 * M_pad * K_pad * N_pad,
        transcendentals=0,
        bytes_accessed=(M_pad * K_pad + K_pad * N_pad + M_pad * N_pad) * itemsize
        + N_pad * 4,
    )

    out2d = pl.pallas_call(
        _linear_kernel,
        out_shape=jax.ShapeDtypeStruct((M_pad, N_pad), out_dtype),
        grid_spec=pltpu.PrefetchScalarGridSpec(
            num_scalar_prefetch=0,
            grid=(grid_m,),
            in_specs=[
                pl.BlockSpec((tile_m, K_pad), lambda i: (i, 0)),   # x tile, pipelined
                pl.BlockSpec((N_pad, K_pad), lambda i: (0, 0)),    # weight, resident
                pl.BlockSpec((1, N_pad), lambda i: (0, 0)),        # bias, resident
            ],
            out_specs=pl.BlockSpec((tile_m, N_pad), lambda i: (i, 0)),
        ),
        compiler_params=pltpu.CompilerParams(
            dimension_semantics=("parallel",),     # shard M across TCs on v7x
            vmem_limit_bytes=vmem_limit,
        ),
        cost_estimate=cost,
    )(x2d, w_p, b_p)

    # Drop padding, un-collapse (B*T, H_out) -> (B, T, H_out)  [same as x.view(B,T,-1)]
    return out2d[:M, :H_out].reshape(B, T, H_out)


if __name__ == "__main__":
    # Small shapes consistent with the forward: batch=2, time=8, hidden=32.
    B, T, H_in, H_out = 2, 8, 32, 32

    key = jax.random.PRNGKey(0)
    kx, kw, kb = jax.random.split(key, 3)

    x = jax.random.normal(kx, (B, T, H_in), dtype=jnp.float32)

    # Deterministic nn.Linear-style init: U(-1/sqrt(H_in), +1/sqrt(H_in)).
    bound = 1.0 / (H_in ** 0.5)
    weight = jax.random.uniform(kw, (H_out, H_in), dtype=jnp.float32,
                                minval=-bound, maxval=bound)
    bias = jax.random.uniform(kb, (H_out,), dtype=jnp.float32,
                              minval=-bound, maxval=bound)

    out = sequence_wise_linear(x, weight, bias)
    out = jax.block_until_ready(out)

    # Reference check against plain-JAX math (same semantics as PyTorch).
    ref = (x.reshape(B * T, H_in) @ weight.T + bias).reshape(B, T, H_out)
    assert out.shape == (B, T, H_out)
    assert jnp.allclose(out, ref, atol=1e-5, rtol=1e-5)

    print("KERNEL_OK")
</pallas_src>

<mosaic_0001>
module attributes {stable_mosaic.version = 11 : i64} {
  func.func @_linear_kernel(%arg0: i32, %arg1: memref<16x128xf32, #tpu.memory_space<vmem>>, %arg2: memref<128x128xf32, #tpu.memory_space<vmem>>, %arg3: memref<1x128xf32, #tpu.memory_space<vmem>>, %arg4: memref<16x128xf32, #tpu.memory_space<vmem>>) attributes {dimension_semantics = [#tpu.dimension_semantics<parallel>], iteration_bounds = array<i64: 1>, scalar_prefetch = 0 : i64, scratch_operands = 0 : i64, tpu.core_type = #tpu.core_type<tc>, window_params = [{transform_indices = @transform_0, window_bounds = array<i64: 16, 128>}, {pipeline_mode = #tpu.pipeline_mode<synchronous>, transform_indices = @transform_1, window_bounds = array<i64: 128, 128>}, {pipeline_mode = #tpu.pipeline_mode<synchronous>, transform_indices = @transform_2, window_bounds = array<i64: 1, 128>}, {transform_indices = @transform_3, window_bounds = array<i64: 16, 128>}]} {
    %c0 = arith.constant 0 : index
    %c0_0 = arith.constant 0 : index
    %0 = vector.load %arg1[%c0, %c0_0] : memref<16x128xf32, #tpu.memory_space<vmem>>, vector<16x128xf32>
    %c0_1 = arith.constant 0 : index
    %c0_2 = arith.constant 0 : index
    %1 = vector.load %arg2[%c0_1, %c0_2] : memref<128x128xf32, #tpu.memory_space<vmem>>, vector<128x128xf32>
    %cst = arith.constant dense<0.000000e+00> : vector<16x128xf32>
    %2 = tpu.matmul %0, %1, %cst {dimension_numbers = #tpu.dot_dimension_numbers<[1], [1], [0], [0], [0, 0, 1, 0], [], []>} : vector<16x128xf32>, vector<128x128xf32>, vector<16x128xf32> -> vector<16x128xf32>
    %c0_3 = arith.constant 0 : index
    %c0_4 = arith.constant 0 : index
    %3 = vector.load %arg3[%c0_3, %c0_4] : memref<1x128xf32, #tpu.memory_space<vmem>>, vector<1x128xf32>
    %4 = vector.broadcast %3 : vector<1x128xf32> to vector<16x128xf32>
    %5 = arith.addf %2, %4 : vector<16x128xf32>
    %c0_5 = arith.constant 0 : index
    %c0_6 = arith.constant 0 : index
    %6 = vector.load %arg4[%c0_5, %c0_6] : memref<16x128xf32, #tpu.memory_space<vmem>>, vector<16x128xf32>
    tpu.vector_store %arg4[%c0_5, %c0_6], %5 {strides = array<i32>} : memref<16x128xf32, #tpu.memory_space<vmem>>, vector<16x128xf32>,
    return
  }
  func.func @transform_0(%arg0: i32) -> (i32, i32) {
    %c0_i32 = arith.constant 0 : i32
    %c0_i32_0 = arith.constant 0 : i32
    return %arg0, %c0_i32 : i32, i32
  }
  func.func @transform_1(%arg0: i32) -> (i32, i32) {
    %c0_i32 = arith.constant 0 : i32
    %c0_i32_0 = arith.constant 0 : i32
    %c0_i32_1 = arith.constant 0 : i32
    return %c0_i32, %c0_i32_0 : i32, i32
  }
  func.func @transform_2(%arg0: i32) -> (i32, i32) {
    %c0_i32 = arith.constant 0 : i32
    %c0_i32_0 = arith.constant 0 : i32
    %c0_i32_1 = arith.constant 0 : i32
    return %c0_i32, %c0_i32_0 : i32, i32
  }
  func.func @transform_3(%arg0: i32) -> (i32, i32) {
    %c0_i32 = arith.constant 0 : i32
    %c0_i32_0 = arith.constant 0 : i32
    return %arg0, %c0_i32 : i32, i32
  }
}

</mosaic_0001>

<bundles_post_ra>
// kernel: tpu_custom_call.1
= control target key start
LH: loop header
LB: loop body
LE: loop exit
PB: predicated region body
PF: predicated region fallthrough
CT: control target
= control target key end

     0   :  { %8 = vsyncpa [#allocation3], 0  ;;  %s334_s0 = inlined_call_operand.hbm [shape: f32[16,128], index: 0, kind: input, shape index: {}]   ;;  %s335_s1 = inlined_call_operand.hbm [shape: f32[128,128], index: 1, kind: input, shape index: {}]   ;;  %s336_s2 = inlined_call_operand.vmem [shape: f32[1,128], index: 2, kind: input, shape index: {}]   ;;  %s337_s3 = inlined_call_operand.hbm [shape: f32[16,128], index: 3, kind: output, shape index: {}]  }
   0x1   :  { %9 = vsyncpa [#allocation6], 0 }
   0x2   :  { %10 = vsyncpa [#allocation4], 0  ;;  %s288_s12 = smov [#allocation2]  }
   0x3   :  { %s16_s13 = sshll.u32 %s288_s12, 4  ;;  %s17_s13 = int_to_ptr.vmem [resolvable:$true] %s16_s13 }
   0x4   :  { %s230_s14 = scalar_lea.vmem %s17_s13, 256  ;;  %p235_p1 = scmp.lt.s32.totalorder %s17_s13, %s17_s13 }
   0x5   :  { %p231_p0 = scmp.ne.s32.totalorder %s17_s13, %s230_s14  ;;  %p236_p2 = scmp.lt.s32.totalorder %s230_s14, %s230_s14 }
   0x7   :  { %p237_p3 = por %p236_p2, %p235_p1 }
   0x9   :  { %p238_p4 = pnand %p237_p3, %p231_p0 }
   0xb   :  { %241 = shalt.err (!%p238_p4)
}
   0xc   :  { %s289_s15 = smov 128   ;;  %s290_s16 = smov 8  }
   0xd   :  { %22 = dma.hbm_to_vmem [thread:$0]  %s334_s0, 256, %s17_s13, [#allocation3], %s289_s15, %s289_s15, %s290_s16  }
   0xe   :  { %s291_s19 = smov [#allocation5]  }
   0xf   :  { %s28_s20 = sshll.u32 %s291_s19, 4  ;;  %s29_s20 = int_to_ptr.vmem [resolvable:$true] %s28_s20 }
  0x10   :  { %s250_s21 = scalar_lea.vmem %s29_s20, 2048  ;;  %p255_p6 = scmp.lt.s32.totalorder %s29_s20, %s29_s20 }
  0x11   :  { %p251_p5 = scmp.ne.s32.totalorder %s29_s20, %s250_s21  ;;  %p256_p7 = scmp.lt.s32.totalorder %s250_s21, %s250_s21 }
  0x13   :  { %p257_p8 = por %p256_p7, %p255_p6 }
  0x15   :  { %p258_p9 = pnand %p257_p8, %p251_p5 }
  0x17   :  { %261 = shalt.err (!%p258_p9)
}
  0x18   :  { %34 = dma.hbm_to_vmem [thread:$0]  %s335_s1, 2048, %s29_s20, [#allocation6], %s289_s15, %s289_s15, %s290_s16  }
  0x19   :  { %282 = dma.done.wait [#allocation3], 256  }
  0x1a   :  { %283 = vsyncadd [#allocation3], 4294967040 }
  0x1b   :  { %284 = dma.done.wait [#allocation6], 2048  }
  0x1c   :  { %285 = vsyncadd [#allocation6], 4294965248  ;;  %v60_v0 = vld [vmem:[#allocation5 + $0x78] sm:$0xff]  ;;  %v59_v1 = vld [vmem:[#allocation5 + $0x70] sm:$0xff]  ;;  %s292_s24 = smov [#allocation7]  }
  0x1d   :  { %182 = vmatprep.subr.mxu0 %v60_v0  ;;  %v58_v2 = vld [vmem:[#allocation5 + $0x68] sm:$0xff]  ;;  %v43_v3 = vld [vmem:[#allocation2] sm:$0xff]  ;;  %v57_v4 = vld [vmem:[#allocation5 + $0x60] sm:$0xff]  ;;  %s150_s25 = sshll.u32 %s292_s24, 4  ;;  %s151_s25 = int_to_ptr.vmem [resolvable:$true] %s150_s25 }
  0x1e   :  { %183 = vmatpush3.xpose.msra.mxu0 %v60_v0  ;;  %214 = vmatprep.mubr.f32.mxu0 %v43_v3  ;;  %v56_v5 = vld [vmem:[#allocation5 + $0x58] sm:$0xff]  ;;  %v55_v6 = vld [vmem:[#allocation5 + $0x50] sm:$0xff]  ;;  %v54_v7 = vld [vmem:[#allocation5 + $0x48] sm:$0xff]  ;;  %s262_s26 = scalar_lea.vmem %s151_s25, 256  ;;  %p267_p11 = scmp.lt.s32.totalorder %s151_s25, %s151_s25 }
  0x1f   :  { %184 = vmatprep.subr.mxu0 %v59_v1  ;;  %v53_v8 = vld [vmem:[#allocation5 + $0x40] sm:$0xff]  ;;  %v52_v9 = vld [vmem:[#allocation5 + $0x38] sm:$0xff]  ;;  %v51_v10 = vld [vmem:[#allocation5 + $0x30] sm:$0xff]  ;;  %p263_p10 = scmp.ne.s32.totalorder %s151_s25, %s262_s26  ;;  %p268_p12 = scmp.lt.s32.totalorder %s262_s26, %s262_s26 }
  0x20   :  { %v50_v11 = vld [vmem:[#allocation5 + $0x28] sm:$0xff]  ;;  %v49_v12 = vld [vmem:[#allocation5 + $0x20] sm:$0xff]  ;;  %v48_v13 = vld [vmem:[#allocation5 + $0x18] sm:$0xff] }
  0x21   :  { %v47_v14 = vld [vmem:[#allocation5 + $0x10] sm:$0xff]  ;;  %v46_v15 = vld [vmem:[#allocation5 + $0x8] sm:$0xff]  ;;  %v45_v16 = vld [vmem:[#allocation5] sm:$0xff]  ;;  %p269_p13 = por %p268_p12, %p267_p11 }
  0x22   :  { %185 = vmatpush3.xpose.msra.mxu0 %v59_v1  ;;  %v44_v17 = vld [vmem:[#allocation2 + $0x8] sm:$0xff]  ;;  %v163_v18 = vld [vmem:[%s336_s2] ss:$0 sm:$0xff] }
  0x23   :  { %186 = vmatprep.subr.mxu0 %v58_v2  ;;  %p270_p0 = pnand %p269_p13, %p263_p10 }
  0x26   :  { %187 = vmatpush3.xpose.msra.mxu0 %v58_v2 }
  0x27   :  { %188 = vmatprep.subr.mxu0 %v57_v4 }
  0x2a   :  { %189 = vmatpush3.xpose.msra.mxu0 %v57_v4 }
  0x2b   :  { %190 = vmatprep.subr.mxu0 %v56_v5 }
  0x2e   :  { %191 = vmatpush3.xpose.msra.mxu0 %v56_v5 }
  0x2f   :  { %192 = vmatprep.subr.mxu0 %v55_v6 }
  0x32   :  { %193 = vmatpush3.xpose.msra.mxu0 %v55_v6 }
  0x33   :  { %194 = vmatprep.subr.mxu0 %v54_v7 }
  0x36   :  { %195 = vmatpush3.xpose.msra.mxu0 %v54_v7 }
  0x37   :  { %196 = vmatprep.subr.mxu0 %v53_v8 }
  0x3a   :  { %197 = vmatpush3.xpose.msra.mxu0 %v53_v8 }
  0x3b   :  { %198 = vmatprep.subr.mxu0 %v52_v9 }
  0x3e   :  { %199 = vmatpush3.xpose.msra.mxu0 %v52_v9 }
  0x3f   :  { %200 = vmatprep.subr.mxu0 %v51_v10 }
  0x42   :  { %201 = vmatpush3.xpose.msra.mxu0 %v51_v10 }
  0x43   :  { %202 = vmatprep.subr.mxu0 %v50_v11 }
  0x46   :  { %203 = vmatpush3.xpose.msra.mxu0 %v50_v11 }
  0x47   :  { %204 = vmatprep.subr.mxu0 %v49_v12 }
  0x4a   :  { %205 = vmatpush3.xpose.msra.mxu0 %v49_v12 }
  0x4b   :  { %206 = vmatprep.subr.mxu0 %v48_v13 }
  0x4e   :  { %207 = vmatpush3.xpose.msra.mxu0 %v48_v13 }
  0x4f   :  { %208 = vmatprep.subr.mxu0 %v47_v14 }
  0x52   :  { %209 = vmatpush3.xpose.msra.mxu0 %v47_v14 }
  0x53   :  { %210 = vmatprep.subr.mxu0 %v46_v15 }
  0x56   :  { %211 = vmatpush3.xpose.msra.mxu0 %v46_v15 }
  0x57   :  { %212 = vmatprep.subr.mxu0 %v45_v16 }
  0x5a   :  { %213 = vmatpush3.xpose.msra.mxu0 %v45_v16 }
  0x5d   :  { %215 = vmatmul.mubr.f32.vlgmr.msra.gmra.mxu0 %v44_v17 }
 0x11d   :  { %v216_v19 = vpop.f32.mrf.mxu0 }
 0x11e   :  { %v140_v20 = vadd.f32 %v216_v19, %v163_v18 }
 0x11f   :  { %v134_v21 = vpop.f32.mrf.mxu0 }
 0x120   :  { %144 = vst [vmem:[#allocation7 + $0x8] sm:$0xff] %v140_v20  ;;  %v135_v22 = vadd.f32 %v163_v18, %v134_v21 }
 0x122   :  { %143 = vst [vmem:[#allocation7] sm:$0xff] %v135_v22 }
 0x123   :  { %273 = shalt.err (!%p270_p0)
}
 0x124   :  { %156 = dma.vmem_to_hbm [thread:$0]  %s151_s25, 256, %s337_s3, [#allocation4], %s289_s15, %s289_s15, %s290_s16  }
 0x125   :  { %286 = dma.done.wait [#allocation4], 256  }
 0x126   :  { %287 = vsyncadd [#allocation4], 4294967040 }
 0x127   :  { %160 = vsyncpa [#allocation3], 1 }
 0x128   :  { %161 = vsyncpa [#allocation6], 1 }
 0x129   :  { %162 = vsyncpa [#allocation4], 1 }

</bundles_post_ra>
